<compile_context>
chip_gen: v6e
topology: v6e:2x2x1
jax: 0.10.0
libtpu: 0.0.40
codegen_flags: <defaults>
</compile_context>

<pallas_src>
import math

import jax
import jax.numpy as jnp
from jax import lax
from jax.experimental import pallas as pl
from jax.experimental.pallas import tpu as pltpu

# ---- model dims (small, consistent with the module) ----
B = 2            # batch
S = 8            # sequence length
H = 32           # hidden_size
NH = 4           # num_attention_heads
HD = H // NH     # attention_head_size


def bert_self_attention_kernel(x_ref, m_ref, wqkv_ref, bqkv_ref, out_ref):
    x = x_ref[0]            # (S, H)
    mask = m_ref[0]         # (1, S) additive mask

    # --- fused Q/K/V projection: one MXU push with N=3H lanes ---
    # (scale 1/sqrt(HD) already folded into the Q columns by the wrapper)
    qkv = jnp.dot(x, wqkv_ref[...], preferred_element_type=jnp.float32) + bqkv_ref[...]

    ctx_heads = []
    for h in range(NH):                               # NH=4, static unroll
        qh = qkv[:, h * HD:(h + 1) * HD]              # (S, HD)
        kh = qkv[:, H + h * HD:H + (h + 1) * HD]      # (S, HD)
        vh = qkv[:, 2 * H + h * HD:2 * H + (h + 1) * HD]

        # q @ k^T without an explicit transpose: contract last axis of both operands.
        s = lax.dot_general(qh, kh, (((1,), (1,)), ((), ())),
                            preferred_element_type=jnp.float32)       # (S, S)
        s = s + mask                                  # (S,S) + (1,S) broadcast
        s = s - jnp.max(s, axis=-1, keepdims=True)
        p = jnp.exp(s)
        # normalization on the EUP reciprocal slot instead of a VPU divide
        p = p * pl.reciprocal(jnp.sum(p, axis=-1, keepdims=True), approx=True)
        ctx_heads.append(jnp.dot(p, vh, preferred_element_type=jnp.float32))  # (S, HD)

    # heads concatenated along lanes -> (S, H); stays in registers, single full-tile store.
    ctx = jnp.concatenate(ctx_heads, axis=-1)
    out_ref[0] = ctx.astype(out_ref.dtype)


def bert_self_attention(hidden, attn_mask, wq, bq, wk, bk, wv, bv):
    """BertSelfAttention forward.

    hidden:    (B, S, H) f32
    attn_mask: (B, 1, S) f32 additive mask
    wq/wk/wv:  (H, H)    (in_features, out_features)
    bq/bk/bv:  (1, H)
    returns:   (B, S, H) context layer (heads re-merged), matching the PyTorch module.
    """
    b, s, h = hidden.shape
    scale = 1.0 / math.sqrt(HD)
    # pack all projection weights into one slab; fold the score scale into the Q columns
    wqkv = jnp.concatenate([wq * scale, wk, wv], axis=1)   # (H, 3H)
    bqkv = jnp.concatenate([bq * scale, bk, bv], axis=1)   # (1, 3H)

    return pl.pallas_call(
        bert_self_attention_kernel,
        out_shape=jax.ShapeDtypeStruct((b, s, h), jnp.float32),
        grid=(b,),
        in_specs=[
            pl.BlockSpec((1, s, h), lambda i: (i, 0, 0)),       # hidden states
            pl.BlockSpec((1, 1, s), lambda i: (i, 0, 0)),       # additive mask
            pl.BlockSpec((h, 3 * h), lambda i: (0, 0)),         # packed QKV weights
            pl.BlockSpec((1, 3 * h), lambda i: (0, 0)),         # packed QKV biases
        ],
        out_specs=pl.BlockSpec((1, s, h), lambda i: (i, 0, 0)),
        compiler_params=pltpu.CompilerParams(
            dimension_semantics=("parallel",)),                 # shards over 2 TCs on v7x
    )(hidden, attn_mask, wqkv, bqkv)


def reference_self_attention(hidden, attn_mask, wq, bq, wk, bk, wv, bv):
    """Pure-JAX reference matching the PyTorch BertSelfAttention forward."""
    q = hidden @ wq + bq
    k = hidden @ wk + bk
    v = hidden @ wv + bv

    def split(t):  # (B,S,H) -> (B,NH,S,HD)
        return t.reshape(B, S, NH, HD).transpose(0, 2, 1, 3)

    qh, kh, vh = split(q), split(k), split(v)
    scores = jnp.einsum('bhqd,bhkd->bhqk', qh, kh) / math.sqrt(HD)
    scores = scores + attn_mask[:, :, None, :]         # (B,1,S) -> (B,1,1,S) broadcast
    probs = jax.nn.softmax(scores, axis=-1)
    ctx = jnp.einsum('bhqk,bhkd->bhqd', probs, vh)
    return ctx.transpose(0, 2, 1, 3).reshape(B, S, H)


if __name__ == "__main__":
    key = jax.random.PRNGKey(0)
    k_h, k_m, kq, kk, kv, kbq, kbk, kbv = jax.random.split(key, 8)

    hidden = jax.random.normal(k_h, (B, S, H), jnp.float32)
    # binary attention mask -> extended additive mask, like BERT: (1 - m) * -10000
    m01 = (jax.random.uniform(k_m, (B, 1, S)) > 0.2).astype(jnp.float32)
    attn_mask = (1.0 - m01) * -10000.0

    std = 0.02
    wq = jax.random.normal(kq, (H, H), jnp.float32) * std
    wk = jax.random.normal(kk, (H, H), jnp.float32) * std
    wv = jax.random.normal(kv, (H, H), jnp.float32) * std
    bq = jax.random.normal(kbq, (1, H), jnp.float32) * std
    bk = jax.random.normal(kbk, (1, H), jnp.float32) * std
    bv = jax.random.normal(kbv, (1, H), jnp.float32) * std

    out = bert_self_attention(hidden, attn_mask, wq, bq, wk, bk, wv, bv)
    out = jax.block_until_ready(out)

    ref = reference_self_attention(hidden, attn_mask, wq, bq, wk, bk, wv, bv)

    assert out.shape == (B, S, H)
    assert bool(jnp.all(jnp.isfinite(out)))
    max_err = float(jnp.max(jnp.abs(out - ref)))
    assert max_err < 1e-2, f"mismatch vs reference: {max_err}"
    print("KERNEL_OK")
</pallas_src>

<mosaic_0001>
module attributes {stable_mosaic.version = 11 : i64} {
  func.func @bert_self_attention_kernel(%arg0: i32, %arg1: memref<1x8x32xf32, #tpu.memory_space<vmem>>, %arg2: memref<1x1x8xf32, #tpu.memory_space<vmem>>, %arg3: memref<32x96xf32, #tpu.memory_space<vmem>>, %arg4: memref<1x96xf32, #tpu.memory_space<vmem>>, %arg5: memref<1x8x32xf32, #tpu.memory_space<vmem>>) attributes {dimension_semantics = [#tpu.dimension_semantics<parallel>], iteration_bounds = array<i64: 2>, scalar_prefetch = 0 : i64, scratch_operands = 0 : i64, tpu.core_type = #tpu.core_type<tc>, window_params = [{transform_indices = @transform_0, window_bounds = array<i64: 1, 8, 32>}, {transform_indices = @transform_1, window_bounds = array<i64: 1, 1, 8>}, {pipeline_mode = #tpu.pipeline_mode<synchronous>, transform_indices = @transform_2, window_bounds = array<i64: 32, 96>}, {pipeline_mode = #tpu.pipeline_mode<synchronous>, transform_indices = @transform_3, window_bounds = array<i64: 1, 96>}, {transform_indices = @transform_4, window_bounds = array<i64: 1, 8, 32>}]} {
    %c0 = arith.constant 0 : index
    %c0_0 = arith.constant 0 : index
    %c0_1 = arith.constant 0 : index
    %0 = vector.load %arg1[%c0, %c0_0, %c0_1] : memref<1x8x32xf32, #tpu.memory_space<vmem>>, vector<1x8x32xf32>
    %1 = vector.shape_cast %0 : vector<1x8x32xf32> to vector<8x32xf32>
    %c0_2 = arith.constant 0 : index
    %c0_3 = arith.constant 0 : index
    %c0_4 = arith.constant 0 : index
    %2 = vector.load %arg2[%c0_2, %c0_3, %c0_4] : memref<1x1x8xf32, #tpu.memory_space<vmem>>, vector<1x1x8xf32>
    %3 = vector.shape_cast %2 : vector<1x1x8xf32> to vector<1x8xf32>
    %c0_5 = arith.constant 0 : index
    %c0_6 = arith.constant 0 : index
    %4 = vector.load %arg3[%c0_5, %c0_6] : memref<32x96xf32, #tpu.memory_space<vmem>>, vector<32x96xf32>
    %cst = arith.constant dense<0.000000e+00> : vector<8x96xf32>
    %5 = tpu.matmul %1, %4, %cst {dimension_numbers = #tpu.dot_dimension_numbers<[1], [0], [0], [1], [0, 0, 1, 1], [], []>} : vector<8x32xf32>, vector<32x96xf32>, vector<8x96xf32> -> vector<8x96xf32>
    %c0_7 = arith.constant 0 : index
    %c0_8 = arith.constant 0 : index
    %6 = vector.load %arg4[%c0_7, %c0_8] : memref<1x96xf32, #tpu.memory_space<vmem>>, vector<1x96xf32>
    %7 = vector.broadcast %6 : vector<1x96xf32> to vector<8x96xf32>
    %8 = arith.addf %5, %7 : vector<8x96xf32>
    %9 = vector.extract_strided_slice %8 {offsets = [0, 0], sizes = [8, 8], strides = [1, 1]} : vector<8x96xf32> to vector<8x8xf32>
    %10 = vector.extract_strided_slice %8 {offsets = [0, 32], sizes = [8, 8], strides = [1, 1]} : vector<8x96xf32> to vector<8x8xf32>
    %11 = vector.extract_strided_slice %8 {offsets = [0, 64], sizes = [8, 8], strides = [1, 1]} : vector<8x96xf32> to vector<8x8xf32>
    %cst_9 = arith.constant dense<0.000000e+00> : vector<8x8xf32>
    %12 = tpu.matmul %9, %10, %cst_9 {dimension_numbers = #tpu.dot_dimension_numbers<[1], [1], [0], [0], [0, 0, 1, 0], [], []>} : vector<8x8xf32>, vector<8x8xf32>, vector<8x8xf32> -> vector<8x8xf32>
    %13 = vector.broadcast %3 : vector<1x8xf32> to vector<8x8xf32>
    %14 = arith.addf %12, %13 : vector<8x8xf32>
    %cst_10 = arith.constant dense<0xFF800000> : vector<8xf32>
    %15 = vector.multi_reduction <maximumf>, %14, %cst_10 [1] : vector<8x8xf32> to vector<8xf32>
    %16 = vector.shape_cast %15 : vector<8xf32> to vector<8x1xf32>
    %17 = vector.broadcast %16 : vector<8x1xf32> to vector<8x8xf32>
    %18 = arith.subf %14, %17 : vector<8x8xf32>
    %19 = math.exp %18 : vector<8x8xf32>
    %cst_11 = arith.constant dense<0.000000e+00> : vector<8xf32>
    %20 = vector.multi_reduction <add>, %19, %cst_11 [1] : vector<8x8xf32> to vector<8xf32>
    %21 = vector.shape_cast %20 : vector<8xf32> to vector<8x1xf32>
    %22 = tpu.reciprocal %21 {approx = true} : vector<8x1xf32> -> vector<8x1xf32>
    %23 = vector.broadcast %22 : vector<8x1xf32> to vector<8x8xf32>
    %24 = arith.mulf %19, %23 : vector<8x8xf32>
    %cst_12 = arith.constant dense<0.000000e+00> : vector<8x8xf32>
    %25 = tpu.matmul %24, %11, %cst_12 {dimension_numbers = #tpu.dot_dimension_numbers<[1], [0], [0], [1], [0, 0, 1, 1], [], []>} : vector<8x8xf32>, vector<8x8xf32>, vector<8x8xf32> -> vector<8x8xf32>
    %26 = vector.extract_strided_slice %8 {offsets = [0, 8], sizes = [8, 8], strides = [1, 1]} : vector<8x96xf32> to vector<8x8xf32>
    %27 = vector.extract_strided_slice %8 {offsets = [0, 40], sizes = [8, 8], strides = [1, 1]} : vector<8x96xf32> to vector<8x8xf32>
    %28 = vector.extract_strided_slice %8 {offsets = [0, 72], sizes = [8, 8], strides = [1, 1]} : vector<8x96xf32> to vector<8x8xf32>
    %cst_13 = arith.constant dense<0.000000e+00> : vector<8x8xf32>
    %29 = tpu.matmul %26, %27, %cst_13 {dimension_numbers = #tpu.dot_dimension_numbers<[1], [1], [0], [0], [0, 0, 1, 0], [], []>} : vector<8x8xf32>, vector<8x8xf32>, vector<8x8xf32> -> vector<8x8xf32>
    %30 = vector.broadcast %3 : vector<1x8xf32> to vector<8x8xf32>
    %31 = arith.addf %29, %30 : vector<8x8xf32>
    %cst_14 = arith.constant dense<0xFF800000> : vector<8xf32>
    %32 = vector.multi_reduction <maximumf>, %31, %cst_14 [1] : vector<8x8xf32> to vector<8xf32>
    %33 = vector.shape_cast %32 : vector<8xf32> to vector<8x1xf32>
    %34 = vector.broadcast %33 : vector<8x1xf32> to vector<8x8xf32>
    %35 = arith.subf %31, %34 : vector<8x8xf32>
    %36 = math.exp %35 : vector<8x8xf32>
    %cst_15 = arith.constant dense<0.000000e+00> : vector<8xf32>
    %37 = vector.multi_reduction <add>, %36, %cst_15 [1] : vector<8x8xf32> to vector<8xf32>
    %38 = vector.shape_cast %37 : vector<8xf32> to vector<8x1xf32>
    %39 = tpu.reciprocal %38 {approx = true} : vector<8x1xf32> -> vector<8x1xf32>
    %40 = vector.broadcast %39 : vector<8x1xf32> to vector<8x8xf32>
    %41 = arith.mulf %36, %40 : vector<8x8xf32>
    %cst_16 = arith.constant dense<0.000000e+00> : vector<8x8xf32>
    %42 = tpu.matmul %41, %28, %cst_16 {dimension_numbers = #tpu.dot_dimension_numbers<[1], [0], [0], [1], [0, 0, 1, 1], [], []>} : vector<8x8xf32>, vector<8x8xf32>, vector<8x8xf32> -> vector<8x8xf32>
    %43 = vector.extract_strided_slice %8 {offsets = [0, 16], sizes = [8, 8], strides = [1, 1]} : vector<8x96xf32> to vector<8x8xf32>
    %44 = vector.extract_strided_slice %8 {offsets = [0, 48], sizes = [8, 8], strides = [1, 1]} : vector<8x96xf32> to vector<8x8xf32>
    %45 = vector.extract_strided_slice %8 {offsets = [0, 80], sizes = [8, 8], strides = [1, 1]} : vector<8x96xf32> to vector<8x8xf32>
    %cst_17 = arith.constant dense<0.000000e+00> : vector<8x8xf32>
    %46 = tpu.matmul %43, %44, %cst_17 {dimension_numbers = #tpu.dot_dimension_numbers<[1], [1], [0], [0], [0, 0, 1, 0], [], []>} : vector<8x8xf32>, vector<8x8xf32>, vector<8x8xf32> -> vector<8x8xf32>
    %47 = vector.broadcast %3 : vector<1x8xf32> to vector<8x8xf32>
    %48 = arith.addf %46, %47 : vector<8x8xf32>
    %cst_18 = arith.constant dense<0xFF800000> : vector<8xf32>
    %49 = vector.multi_reduction <maximumf>, %48, %cst_18 [1] : vector<8x8xf32> to vector<8xf32>
    %50 = vector.shape_cast %49 : vector<8xf32> to vector<8x1xf32>
    %51 = vector.broadcast %50 : vector<8x1xf32> to vector<8x8xf32>
    %52 = arith.subf %48, %51 : vector<8x8xf32>
    %53 = math.exp %52 : vector<8x8xf32>
    %cst_19 = arith.constant dense<0.000000e+00> : vector<8xf32>
    %54 = vector.multi_reduction <add>, %53, %cst_19 [1] : vector<8x8xf32> to vector<8xf32>
    %55 = vector.shape_cast %54 : vector<8xf32> to vector<8x1xf32>
    %56 = tpu.reciprocal %55 {approx = true} : vector<8x1xf32> -> vector<8x1xf32>
    %57 = vector.broadcast %56 : vector<8x1xf32> to vector<8x8xf32>
    %58 = arith.mulf %53, %57 : vector<8x8xf32>
    %cst_20 = arith.constant dense<0.000000e+00> : vector<8x8xf32>
    %59 = tpu.matmul %58, %45, %cst_20 {dimension_numbers = #tpu.dot_dimension_numbers<[1], [0], [0], [1], [0, 0, 1, 1], [], []>} : vector<8x8xf32>, vector<8x8xf32>, vector<8x8xf32> -> vector<8x8xf32>
    %60 = vector.extract_strided_slice %8 {offsets = [0, 24], sizes = [8, 8], strides = [1, 1]} : vector<8x96xf32> to vector<8x8xf32>
    %61 = vector.extract_strided_slice %8 {offsets = [0, 56], sizes = [8, 8], strides = [1, 1]} : vector<8x96xf32> to vector<8x8xf32>
    %62 = vector.extract_strided_slice %8 {offsets = [0, 88], sizes = [8, 8], strides = [1, 1]} : vector<8x96xf32> to vector<8x8xf32>
    %cst_21 = arith.constant dense<0.000000e+00> : vector<8x8xf32>
    %63 = tpu.matmul %60, %61, %cst_21 {dimension_numbers = #tpu.dot_dimension_numbers<[1], [1], [0], [0], [0, 0, 1, 0], [], []>} : vector<8x8xf32>, vector<8x8xf32>, vector<8x8xf32> -> vector<8x8xf32>
    %64 = vector.broadcast %3 : vector<1x8xf32> to vector<8x8xf32>
    %65 = arith.addf %63, %64 : vector<8x8xf32>
    %cst_22 = arith.constant dense<0xFF800000> : vector<8xf32>
    %66 = vector.multi_reduction <maximumf>, %65, %cst_22 [1] : vector<8x8xf32> to vector<8xf32>
    %67 = vector.shape_cast %66 : vector<8xf32> to vector<8x1xf32>
    %68 = vector.broadcast %67 : vector<8x1xf32> to vector<8x8xf32>
    %69 = arith.subf %65, %68 : vector<8x8xf32>
    %70 = math.exp %69 : vector<8x8xf32>
    %cst_23 = arith.constant dense<0.000000e+00> : vector<8xf32>
    %71 = vector.multi_reduction <add>, %70, %cst_23 [1] : vector<8x8xf32> to vector<8xf32>
    %72 = vector.shape_cast %71 : vector<8xf32> to vector<8x1xf32>
    %73 = tpu.reciprocal %72 {approx = true} : vector<8x1xf32> -> vector<8x1xf32>
    %74 = vector.broadcast %73 : vector<8x1xf32> to vector<8x8xf32>
    %75 = arith.mulf %70, %74 : vector<8x8xf32>
    %cst_24 = arith.constant dense<0.000000e+00> : vector<8x8xf32>
    %76 = tpu.matmul %75, %62, %cst_24 {dimension_numbers = #tpu.dot_dimension_numbers<[1], [0], [0], [1], [0, 0, 1, 1], [], []>} : vector<8x8xf32>, vector<8x8xf32>, vector<8x8xf32> -> vector<8x8xf32>
    %77 = tpu.concatenate %25, %42, %59, %76 in 1 : vector<8x8xf32>, vector<8x8xf32>, vector<8x8xf32>, vector<8x8xf32> -> vector<8x32xf32>
    %c0_25 = arith.constant 0 : index
    %c0_26 = arith.constant 0 : index
    %c0_27 = arith.constant 0 : index
    %78 = vector.load %arg5[%c0_25, %c0_26, %c0_27] : memref<1x8x32xf32, #tpu.memory_space<vmem>>, vector<1x8x32xf32>
    %79 = vector.shape_cast %78 : vector<1x8x32xf32> to vector<8x32xf32>
    %80 = vector.shape_cast %77 : vector<8x32xf32> to vector<1x8x32xf32>
    tpu.vector_store %arg5[%c0_25, %c0_26, %c0_27], %80 {strides = array<i32>} : memref<1x8x32xf32, #tpu.memory_space<vmem>>, vector<1x8x32xf32>,
    return
  }
  func.func @transform_0(%arg0: i32) -> (i32, i32, i32) {
    %c0_i32 = arith.constant 0 : i32
    %c0_i32_0 = arith.constant 0 : i32
    %c0_i32_1 = arith.constant 0 : i32
    return %arg0, %c0_i32, %c0_i32_0 : i32, i32, i32
  }
  func.func @transform_1(%arg0: i32) -> (i32, i32, i32) {
    %c0_i32 = arith.constant 0 : i32
    %c0_i32_0 = arith.constant 0 : i32
    %c0_i32_1 = arith.constant 0 : i32
    return %arg0, %c0_i32, %c0_i32_0 : i32, i32, i32
  }
  func.func @transform_2(%arg0: i32) -> (i32, i32) {
    %c0_i32 = arith.constant 0 : i32
    %c0_i32_0 = arith.constant 0 : i32
    %c0_i32_1 = arith.constant 0 : i32
    return %c0_i32, %c0_i32_0 : i32, i32
  }
  func.func @transform_3(%arg0: i32) -> (i32, i32) {
    %c0_i32 = arith.constant 0 : i32
    %c0_i32_0 = arith.constant 0 : i32
    %c0_i32_1 = arith.constant 0 : i32
    return %c0_i32, %c0_i32_0 : i32, i32
  }
  func.func @transform_4(%arg0: i32) -> (i32, i32, i32) {
    %c0_i32 = arith.constant 0 : i32
    %c0_i32_0 = arith.constant 0 : i32
    %c0_i32_1 = arith.constant 0 : i32
    return %arg0, %c0_i32, %c0_i32_0 : i32, i32, i32
  }
}

</mosaic_0001>

<bundles_post_ra>
// kernel: tpu_custom_call.1
= control target key start
LH: loop header
LB: loop body
LE: loop exit
PB: predicated region body
PF: predicated region fallthrough
CT: control target
= control target key end

     0   :  { %9 = vsyncpa [#allocation3], 0  ;;  %s1826_s0 = inlined_call_operand.hbm [shape: f32[2,8,32], index: 0, kind: input, shape index: {}]   ;;  %s1827_s1 = inlined_call_operand.hbm [shape: f32[2,1,8], index: 1, kind: input, shape index: {}]   ;;  %s1828_s2 = inlined_call_operand.hbm [shape: f32[32,96], index: 2, kind: input, shape index: {}]   ;;  %s1829_s3 = inlined_call_operand.vmem [shape: f32[1,96], index: 3, kind: input, shape index: {}]   ;;  %s1830_s4 = inlined_call_operand.hbm [shape: f32[2,8,32], index: 4, kind: output, shape index: {}]  }
   0x1   :  { %11 = vsyncpa [#allocation3 + $0x1], 0 }
   0x2   :  { %12 = vsyncpa [#allocation6], 0 }
   0x3   :  { %14 = vsyncpa [#allocation6 + $0x1], 0 }
   0x4   :  { %15 = vsyncpa [#allocation4], 0 }
   0x5   :  { %17 = vsyncpa [#allocation4 + $0x1], 0  ;;  %s1546_s15 = smov 0   ;;  %s1548_s16 = smov 0  }
   0x6   :  { %s1550_s17 = smov 0   ;;  %s1552_s18 = smov 0  }
   0x7 LB: > { %s1567_s19 = sadd.s32 4294967295, %s1497_s18   ;;  %s1145_s20 = sadd.s32 4294967294, %s1497_s18   ;;  %s1497_s18 = sphi %s1552_s18, %s1852_s18   ;;  %s1493_s17 = sphi %s1550_s17, %s1851_s17   ;;  %s1489_s16 = sphi %s1548_s16, %s1850_s16   ;;  %s1485_s15 = sphi %s1546_s15, %s1849_s15  }
   0x8   : > { %p43_p0 = scmp.ne.s32.totalorder %s1489_s16, %s1485_s15  ;;  %p1831_p1 = scmp.eq.s32.totalorder %s1567_s19, 0 }
   0x9   : > { %p141_p3 = scmp.eq.s32.totalorder %s1145_s20, 1  ;;  %p1146_p5 = scmp.ge.s32.totalorder %s1497_s18, 1 }
   0xa   : > { %p1576_p4 = por %p1831_p1, %p43_p0  ;;  %p148_p7 = scmp.lt.s32.totalorder %s1497_s18, 3 }
   0xb   : > { %p1581_p6 = por %p141_p3, %p43_p0  ;;  %s1499_s24 = smov [#allocation7]  }
   0xc   : > { %s1835_s21 = scalar_select %p1576_p4, 1, 0 }
   0xd   : > { %s1836_s22 = scalar_select %p1581_p6, 1, 0 }
   0xe   : > { %p1586_p8 = pnand %p1146_p5, %p148_p7  ;;  %s160_s25 = sshll.u32 %s1499_s24, 4  ;;  %s161_s25 = int_to_ptr.vmem [resolvable:$true] %s160_s25 }
   0xf   : > { %s1600_s27 = sadd.s32 1, %s1497_s18   ;;  %s30_s28 = sadd.s32 1, %s1493_s17 }
  0x10   : > { %s1837_s23 = scalar_select %p1586_p8, 1, 0 }
  0x11   : > { %p1257_p9 = pneg %p1586_p8  ;;  %s27_s29 = ssub.s32 %s1497_s18, %s1600_s27 }
  0x12   : > { %s1354_s30 = scalar_lea.vmem %s161_s25, 512  ;;  %p1362_p5 = scmp.lt.s32.totalorder %s161_s25, %s161_s25 }
  0x13   : > { %p1595_p11 = pnand %p1257_p9, %p1831_p1  ;;  %p1355_p13 = scmp.ne.s32.totalorder %s161_s25, %s1354_s30 }
  0x14   : > { %p1363_p7 = scmp.lt.s32.totalorder %s1354_s30, %s1354_s30 }
  0x15   : > { %p1345_p12 = pneg %p1595_p11 }
  0x16   : > { %p1364_p10 = por %p1363_p7, %p1362_p5 }
  0x17   : > { %p1357_p0 = pnand %p1355_p13, %p1345_p12 }
  0x19   : > { %p1358_p3 = pneg %p1357_p0 }
  0x1b   : > { %p1365_p2 = pnand %p1364_p10, %p1358_p3 }
  0x1d   : > { %1368 = shalt.err (!%p1365_p2)
}
  0x1e   : > { %s1500_s5 = smov 128   ;;  %s1501_s6 = smov 8  }
  0x1f   : > { %1260 = dma.hbm_to_vmem [thread:$0]  (!%p1595_p11), %s1828_s2, 512, %s161_s25, [#allocation6], %s1500_s5, %s1500_s5, %s1501_s6  }
  0x20   : > { %p28_p9 = scmp.eq.s32.totalorder %s27_s29, 0  ;;  %p37_p10 = scmp.ne.s32.totalorder %s1493_s17, %s1489_s16 }
  0x21   : > { %p38_p2 = scmp.eq.s32.totalorder %s1497_s18, 0  ;;  %p1273_p12 = scmp.lt.s32.totalorder %s1497_s18, 2 }
  0x22   : > { %s1617_s9 = scalar_select %p28_p9, %s1493_s17, %s30_s28  }
  0x23   : > { %p39_p13 = por %p38_p2, %p37_p10  ;;  %p1839_p0 = scmp.eq.s32.totalorder %s1567_s19, 1 }
  0x24   : > { %s1626_s11 = sand.u32 1, %s1493_s17   ;;  %s1150_s12 = sshll.u32 %s1497_s18, 7 }
  0x25   : > { %p1621_p3 = por %p1839_p0, %p37_p10  ;;  %s1149_s13 = sshll.u32 %s1626_s11, 3 }
  0x26   : > { %s1633_s24 = scalar_lea.hbm %s1826_s0, %s1150_s12  ;;  %s181_s25 = scalar_lea.vmem [#allocation2], %s1149_s13 }
  0x27   : > { %s1840_s10 = scalar_select %p1621_p3, 1, 0 }
  0x28   : > { %s188_s26 = sshll.u32 %s181_s25, 4  ;;  %p1635_p11 = pnand %p1273_p12, %p39_p13  ;;  %s189_s26 = int_to_ptr.vmem [resolvable:$true] %s188_s26 }
  0x29   : > { %s195_s29 = sand.u32 1, %s1497_s18   ;;  %s178_s30 = scalar_lea.sflag [#allocation3], %s1626_s11 }
  0x2a   : > { %s1369_s5 = scalar_lea.hbm %s1633_s24, 128  ;;  %p1371_p7 = pneg %p1635_p11 }
  0x2b   : > { %p1370_p5 = scmp.ne.s32.totalorder %s1633_s24, %s1369_s5  ;;  %s1374_s8 = scalar_lea.hbm %s1826_s0, 256 }
  0x2c   : > { %p1375_p2 = scmp.lt.s32.totalorder %s1633_s24, %s1826_s0  ;;  %p1376_p12 = scmp.lt.s32.totalorder %s1374_s8, %s1369_s5 }
  0x2d   : > { %p1372_p9 = pnand %p1371_p7, %p1370_p5 }
  0x2e   : > { %p1377_p13 = por %p1376_p12, %p1375_p2 }
  0x2f   : > { %p1373_p10 = pneg %p1372_p9 }
  0x31   : > { %p1378_p0 = pnand %p1377_p13, %p1373_p10 }
  0x33   : > { %1381 = shalt.err (!%p1378_p0)
}
  0x34   : > { %s1382_s14 = scalar_lea.vmem %s189_s26, 128  ;;  %s1502_s20 = smov [#allocation2]  }
  0x35   : > { %p1383_p1 = scmp.ne.s32.totalorder %s189_s26, %s1382_s14  ;;  %s1387_s25 = sshll.u32 %s1502_s20, 4  ;;  %s1388_s25 = int_to_ptr.vmem [resolvable:$false] %s1387_s25 }
  0x36   : > { %s1389_s6 = scalar_lea.vmem %s1388_s25, 256  ;;  %p1390_p9 = scmp.lt.s32.totalorder %s189_s26, %s1388_s25 }
  0x37   : > { %p1385_p6 = pnand %p1383_p1, %p1371_p7  ;;  %p1391_p3 = scmp.lt.s32.totalorder %s1389_s6, %s1382_s14 }
  0x39   : > { %p1386_p5 = pneg %p1385_p6  ;;  %p1392_p4 = por %p1391_p3, %p1390_p9 }
  0x3b   : > { %p1393_p8 = pnand %p1392_p4, %p1386_p5 }
  0x3d   : > { %1396 = shalt.err (!%p1393_p8)
}
  0x3e   : > { %1264 = dma.hbm_to_vmem [thread:$0]  (!%p1635_p11), %s1633_s24, 128, %s189_s26, %s178_s30  }
  0x3f   : > { %s1151_s5 = sshll.u32 %s1497_s18, 4  ;;  %s198_s13 = scalar_lea.vmem [#allocation5], %s1626_s11 }
  0x40   : > { %s1665_s12 = scalar_lea.hbm %s1827_s1, %s1151_s5  ;;  %s205_s14 = sshll.u32 %s198_s13, 4  ;;  %s206_s14 = int_to_ptr.vmem [resolvable:$true] %s205_s14 }
  0x41   : > { %s196_s20 = scalar_lea.sflag [#allocation6], %s195_s29  ;;  %s1397_s25 = scalar_lea.hbm %s1665_s12, 16 }
  0x42   : > { %p1398_p1 = scmp.ne.s32.totalorder %s1665_s12, %s1397_s25  ;;  %s1402_s30 = scalar_lea.hbm %s1827_s1, 32 }
  0x43   : > { %p1403_p8 = scmp.lt.s32.totalorder %s1665_s12, %s1827_s1  ;;  %p1404_p3 = scmp.lt.s32.totalorder %s1402_s30, %s1397_s25 }
  0x44   : > { %p1400_p4 = pnand %p1398_p1, %p1371_p7 }
  0x45   : > { %p1405_p10 = por %p1404_p3, %p1403_p8 }
  0x46   : > { %p1401_p6 = pneg %p1400_p4 }
  0x48   : > { %p1406_p2 = pnand %p1405_p10, %p1401_p6 }
  0x4a   : > { %1409 = shalt.err (!%p1406_p2)
}
  0x4b   : > { %s1410_s11 = scalar_lea.vmem %s206_s14, 16  ;;  %s1503_s29 = smov [#allocation5]  }
  0x4c   : > { %p1411_p12 = scmp.ne.s32.totalorder %s206_s14, %s1410_s11  ;;  %s1415_s7 = sshll.u32 %s1503_s29, 4  ;;  %s1416_s7 = int_to_ptr.vmem [resolvable:$false] %s1415_s7 }
  0x4d   : > { %s1417_s8 = scalar_lea.vmem %s1416_s7, 32  ;;  %p1418_p5 = scmp.lt.s32.totalorder %s206_s14, %s1416_s7 }
  0x4e   : > { %p1413_p13 = pnand %p1411_p12, %p1371_p7  ;;  %p1419_p9 = scmp.lt.s32.totalorder %s1417_s8, %s1410_s11 }
  0x50   : > { %p1414_p0 = pneg %p1413_p13  ;;  %p1420_p1 = por %p1419_p9, %p1418_p5 }
  0x52   : > { %p1421_p4 = pnand %p1420_p1, %p1414_p0 }
  0x54   : > { %1424 = shalt.err (!%p1421_p4)
}
  0x55   : > { %1267 = dma.hbm_to_vmem [thread:$0]  (!%p1635_p11), %s1665_s12, 16, %s206_s14, %s196_s20  }
  0x56   : > { %p1842_p6 = scmp.ne.s32.totalorder %s1837_s23, 0 }
  0x57   : > { %s1691_s13 = sand.u32 (!%p1842_p6), 1, %s1489_s16   ;;  %p1843_p7 = scmp.ne.s32.totalorder (!%p1842_p6), %s1835_s21, 0 }
  0x58   : > { %214 = sbr.rel (%p1842_p6) target bundleno = 1309 (0x51d), region = 36  ;;  %s1153_s25 = sshll.u32 (!%p1842_p6), %s1691_s13, 3 }
  0x59   : > { %s217_s24 = scalar_lea.sflag (!%p1842_p6), [#allocation3], %s1691_s13  ;;  %s220_s26 = scalar_lea.vmem (!%p1842_p6), [#allocation2], %s1153_s25 }
  0x5d   : > { %1468 = dma.done.wait (%p1843_p7), %s217_s24, 128  }
  0x5e   : > { %1470 = vsyncadd (%p1843_p7), %s217_s24, 4294967168  ;;  %s225_s23 = sand.u32 1, %s1567_s19   ;;  %s228_s12 = scalar_lea.vmem [#allocation5], %s1691_s13 }
  0x5f   : > { %s226_s28 = scalar_lea.sflag [#allocation6], %s225_s23 }
  0x60   : > { %1472 = dma.done.wait (%p1843_p7), %s226_s28, 16  }
  0x61   : > { %1474 = vsyncadd (%p1843_p7), %s226_s28, 4294967280  ;;  %p1844_p11 = scmp.eq.s32.totalorder %s1567_s19, 0 }
  0x63   : > { %1476 = dma.done.wait (%p1844_p11), [#allocation6], 512   ;;  %p1845_p8 = pmov %p1844_p11 }
  0x64   : > { %v1504_v0 = vmov 0.0   ;;  %vm1505_vm0 = vmmov 0   ;;  %v266_v1 = vld [vmem:[#allocation7 + $0x18] sm:$0xff]  ;;  %v265_v2 = vld [vmem:[#allocation7 + $0x10] sm:$0xff]  ;;  %v264_v3 = vld [vmem:[#allocation7 + $0x8] sm:$0xff]  ;;  %vm274_vm1 = vcmask 261120  }
  0x65   : > { %1478 = vsyncadd (%p1845_p8), [#allocation6], 4294966784  ;;  %1196 = vmatprep.subr.mxu0 %v1504_v0  ;;  %1204 = vmatprep.mubr.msk.f32.mxu0 %vm1505_vm0, %v1504_v0  ;;  %v263_v4 = vld [vmem:[#allocation7] sm:$0xff]  ;;  %v261_v5 = vld [vmem:[%s220_s26] sm:$0xff]  ;;  %s1506_s20 = smov 120   ;;  %s1507_s30 = smov 96  }
  0x66   : > { %1207 = vmatprep.subr.mxu1 %v1504_v0  ;;  %1209 = vmatprep.mubr.msk.f32.mxu1 %vm1505_vm0, %v1504_v0  ;;  %v1156_v6 = vld [vmem:[%s1829_s3] ss:$0 sm:$0xff]  ;;  %s1508_s6 = smov 80   ;;  %s1509_s5 = smov 88   ;;  %vm357_vm2 = vcmask 64512   ;;  %vm1027_vm3 = vcmask 130048  }
  0x67   : > { %1197 = vmatpush3.msra.mxu0 %v266_v1  ;;  %s1510_s11 = smov 72   ;;  %s1511_s29 = smov 112   ;;  %v1158_v17 = vld [vmem:[%s228_s12] ss:$0 sm:$0xff]  ;;  %vm1029_vm4 = vcmask 195584  }
  0x68   : > { %1198 = vmatprep.subr.mxu0 %v1504_v0  ;;  %s1512_s7 = smov 104   ;;  %s1513_s8 = smov 56  }
  0x69   : > { %1199 = vmatpush3.msra.mxu0 %v265_v2  ;;  %s1514_s24 = smov 64   ;;  %s1515_s26 = smov 48  }
  0x6a   : > { %1200 = vmatprep.subr.mxu0 %v1504_v0  ;;  %s1516_s23 = smov 40   ;;  %s1517_s28 = smov 8  }
  0x6b   : > { %1201 = vmatpush3.msra.mxu0 %v264_v3  ;;  %s1518_s12 = smov 16   ;;  %s1519_s21 = smov 24  }
  0x6c   : > { %1202 = vmatprep.subr.mxu0 %v1504_v0  ;;  %s1172_s14 = sshll.u32 %s1567_s19, 7  ;;  %p1846_p10 = scmp.ne.s32.totalorder %s1840_s10, 0 }
  0x6d   : > { %1203 = vmatpush3.msra.mxu0 %v263_v4  ;;  %s1520_s19 = smov [#allocation8]  }
  0x6e   : > { %1205 = vmatmul.mubr.msk.f32.vlgmr.msra.gmra.mxu0 %vm274_vm1, %v261_v5  ;;  %1217 = vmatprep.subr.mxu0 %v1504_v0 }
  0x6f   : > { %1219 = vmatprep.mubr.msk.f32.mxu0 %vm1505_vm0, %v1504_v0 }
 0x12e   : > { %v344_v7 = vpop.f32.mrf.mxu0 }
 0x12f   : > { %v1727_v8 = vadd.f32 %v1156_v6, %v344_v7 }
 0x130   : > { %v1206_v9 = vpop.f32.mrf.mxu0 }
 0x131   : > { %519 = vrot.lane.b32.xlu1 %v1727_v8, %s1506_s20  ;;  %355 = vrot.lane.b32.xlu0 %v1727_v8, %s1507_s30  ;;  %s260_s20 = scalar_lea.vmem [#allocation8], %s1153_s25  ;;  %s1429_s25 = sshll.u32 %s1520_s19, 4  ;;  %s1430_s25 = int_to_ptr.vmem [resolvable:$false] %s1429_s25 }
 0x132   : > { %s1046_s30 = sshll.u32 %s260_s20, 4  ;;  %s1047_s30 = int_to_ptr.vmem [resolvable:$true] %s1046_s30 }
 0x133   : > { %p1432_p13 = scmp.lt.s32.totalorder %s1047_s30, %s1430_s25 }
 0x135   : > { %686 = vrot.lane.b32.xlu1 %v1727_v8, %s1508_s6  ;;  %521 = vrot.lane.b32.xlu0 %v1727_v8, %s1509_s5 }
 0x139   : > { %851 = vrot.lane.b32.xlu1 %v1727_v8, %s1510_s11  ;;  %684 = vrot.lane.b32.xlu0 %v1727_v8, %s1511_s29  ;;  %s1788_s11 = scalar_lea.hbm %s1830_s4, %s1172_s14  ;;  %s1033_s29 = scalar_lea.sflag [#allocation4], %s1691_s13 }
 0x13d   : > { %849 = vrot.lane.b32.xlu0 %v1727_v8, %s1512_s7  ;;  %s1425_s7 = scalar_lea.vmem %s1047_s30, 128 }
 0x13e   : > { %p1426_p3 = scmp.ne.s32.totalorder %s1047_s30, %s1425_s7 }
 0x140   : > { %p1427_p2 = pnand %p1426_p3, %p1846_p10 }
 0x142   : > { %p1428_p12 = pneg %p1427_p2 }
 0x1a3   : > { %v520_v10 = vpop.permute.xlu1 %519  ;;  %v356_v11 = vpop.permute.xlu0 %355 }
 0x1a4   : > { %1208 = vmatpush3.xpose.msk.msra.mxu1 %vm357_vm2, %v356_v11 }
 0x1a5   : > { %1212 = vmatprep.subr.mxu1 %v1504_v0 }
 0x1a7   : > { %1210 = vmatmul.mubr.msk.f32.vlgmr.msra.gmra.mxu1 %vm357_vm2, %v1727_v8  ;;  %v522_v12 = vpop.permute.xlu0 %521  ;;  %v687_v13 = vpop.permute.xlu1 %686 }
 0x1a8   : > { %1218 = vmatpush3.xpose.msk.msra.mxu0 %vm357_vm2, %v522_v12  ;;  %1214 = vmatprep.mubr.msk.f32.mxu1 %vm1505_vm0, %v1504_v0 }
 0x1a9   : > { %1227 = vmatprep.subr.mxu0 %v1504_v0 }
 0x1ab   : > { %1220 = vmatmul.mubr.msk.f32.vlgmr.msra.gmra.mxu0 %vm357_vm2, %v520_v10  ;;  %v685_v14 = vpop.permute.xlu0 %684  ;;  %v852_v15 = vpop.permute.xlu1 %851 }
 0x1ac   : > { %1228 = vmatpush3.xpose.msk.msra.mxu0 %vm357_vm2, %v687_v13  ;;  %1229 = vmatprep.mubr.msk.f32.mxu0 %vm1505_vm0, %v1504_v0 }
 0x1ad   : > { %1237 = vmatprep.subr.mxu0 %v1504_v0 }
 0x1af   : > { %1230 = vmatmul.mubr.msk.f32.vlgmr.msra.gmra.mxu0 %vm357_vm2, %v685_v14  ;;  %v850_v16 = vpop.permute.xlu0 %849 }
 0x1b0   : > { %1238 = vmatpush3.xpose.msk.msra.mxu0 %vm357_vm2, %v852_v15  ;;  %1239 = vmatprep.mubr.msk.f32.mxu0 %vm1505_vm0, %v1504_v0 }
 0x1b3   : > { %1240 = vmatmul.mubr.msk.f32.vlgmr.msra.gmra.mxu0 %vm357_vm2, %v850_v16 }
 0x267   : > { %v428_v18 = vpop.f32.mrf.mxu1 }
 0x268   : > { %v429_v19 = vadd.f32 %v1158_v17, %v428_v18 }
 0x269   : > { %v1211_v20 = vpop.f32.mrf.mxu1 }
 0x26a   : > { %v432_v21 = vsel %vm357_vm2, %v429_v19, -inf }
 0x26b   : > { %433 = vmax.xlane.f32.xlu1 %v432_v21  ;;  %v593_v22 = vpop.f32.mrf.mxu0 }
 0x26c   : > { %v594_v23 = vadd.f32 %v1158_v17, %v593_v22 }
 0x26d   : > { %v1221_v24 = vpop.f32.mrf.mxu0 }
 0x26e   : > { %v597_v25 = vsel %vm357_vm2, %v594_v23, -inf }
 0x26f   : > { %598 = vmax.xlane.f32.xlu0 %v597_v25  ;;  %v758_v26 = vpop.f32.mrf.mxu0 }
 0x270   : > { %v759_v27 = vadd.f32 %v1158_v17, %v758_v26 }
 0x271   : > { %v1231_v28 = vpop.f32.mrf.mxu0 }
 0x272   : > { %v762_v29 = vsel %vm357_vm2, %v759_v27, -inf }
 0x273   : > { %763 = vmax.xlane.f32.xlu0 %v762_v29  ;;  %v923_v30 = vpop.f32.mrf.mxu0 }
 0x274   : > { %v924_v31 = vadd.f32 %v1158_v17, %v923_v30 }
 0x275   : > { %v1241_v32 = vpop.f32.mrf.mxu0 }
 0x276   : > { %v927_v33 = vsel %vm357_vm2, %v924_v31, -inf }
 0x277   : > { %928 = vmax.xlane.f32.xlu1 %v927_v33 }
 0x288   : > { %608 = vrot.lane.b32.xlu1 %v1727_v8, %s1513_s8  ;;  %s1431_s8 = scalar_lea.vmem %s1430_s25, 256 }
 0x289   : > { %p1433_p0 = scmp.lt.s32.totalorder %s1431_s8, %s1425_s7 }
 0x28b   : > { %p1434_p5 = por %p1433_p0, %p1432_p13 }
 0x28d   : > { %p1435_p9 = pnand %p1434_p5, %p1428_p12 }
 0x2f4   : > { %v434_v34 = vpop.xlane.xlu1 %433 }
 0x2f5   : > { %v435_v35 = vsub.f32 %v429_v19, %v434_v34 }
 0x2f7   : > { %v436_v36 = vmul.f32 1.442695, %v435_v35 }
 0x2f8   : > { %v599_v37 = vpop.xlane.xlu0 %598 }
 0x2f9   : > { %1327 = vpow2.f32 %v436_v36  ;;  %v600_v38 = vsub.f32 %v594_v23, %v599_v37 }
 0x2fb   : > { %v601_v39 = vmul.f32 1.442695, %v600_v38 }
 0x2fc   : > { %v764_v49 = vpop.xlane.xlu0 %763 }
 0x2fd   : > { %1329 = vpow2.f32 %v601_v39  ;;  %v765_v50 = vsub.f32 %v759_v27, %v764_v49 }
 0x2ff   : > { %v766_v51 = vmul.f32 1.442695, %v765_v50 }
 0x300   : > { %v929_v40 = vpop.xlane.xlu1 %928 }
 0x301   : > { %v930_v41 = vsub.f32 %v924_v31, %v929_v40 }
 0x303   : > { %v931_v42 = vmul.f32 1.442695, %v930_v41 }
 0x304   : > { %v609_v54 = vpop.permute.xlu1 %608 }
 0x305   : > { %1331 = vpow2.f32 %v931_v42 }
 0x306   : > { %v1328_v43 = vpop.eup %1327  ;;  %1333 = vpow2.f32 %v766_v51 }
 0x307   : > { %v438_v44 = vsel %vm357_vm2, %v1328_v43, 0.0 }
 0x308   : > { %439 = vadd.xlane.f32.xlu0 %v438_v44 }
 0x30a   : > { %v1330_v45 = vpop.eup %1329 }
 0x30b   : > { %v603_v46 = vsel %vm357_vm2, %v1330_v45, 0.0 }
 0x30c   : > { %604 = vadd.xlane.f32.xlu1 %v603_v46 }
 0x312   : > { %v1332_v47 = vpop.eup %1331 }
 0x313   : > { %v933_v48 = vsel %vm357_vm2, %v1332_v47, 0.0  ;;  %v1334_v52 = vpop.eup %1333 }
 0x314   : > { %934 = vadd.xlane.f32.xlu1 %v933_v48  ;;  %v768_v53 = vsel %vm357_vm2, %v1334_v52, 0.0 }
 0x31e   : > { %443 = vrot.lane.b32.xlu0 %v1727_v8, %s1514_s24 }
 0x325   : > { %773 = vrot.lane.b32.xlu1 %v1727_v8, %s1515_s26 }
 0x33d   : > { %769 = vadd.xlane.f32.xlu0 %v768_v53 }
 0x353   : > { %938 = vrot.lane.b32.xlu0 %v1727_v8, %s1516_s23 }
 0x391   : > { %v440_v55 = vpop.xlane.xlu0 %439 }
 0x392   : > { %1335 = vrcp.f32 %v440_v55 }
 0x395   : > { %v444_v56 = vpop.permute.xlu0 %443  ;;  %v605_v57 = vpop.xlane.xlu1 %604 }
 0x396   : > { %1337 = vrcp.f32 %v605_v57  ;;  %1213 = vmatpush3.msra.mxu1 %v444_v56 }
 0x397   : > { %1222 = vmatprep.subr.mxu1 %v1504_v0 }
 0x39d   : > { %v935_v59 = vpop.xlane.xlu1 %934 }
 0x39f   : > { %v1336_v58 = vpop.eup %1335 }
 0x3a0   : > { %v442_v60 = vmul.f32 %v1336_v58, %v1328_v43 }
 0x3a1   : > { %v774_v63 = vpop.permute.xlu1 %773 }
 0x3a2   : > { %1215 = vmatmul.mubr.msk.f32.vlgmr.msra.gmra.mxu1 %vm357_vm2, %v442_v60 }
 0x3a3   : > { %v1338_v61 = vpop.eup %1337  ;;  %1223 = vmatpush3.msra.mxu1 %v609_v54  ;;  %1224 = vmatprep.mubr.msk.f32.mxu1 %vm1505_vm0, %v1504_v0 }
 0x3a4   : > { %1232 = vmatprep.subr.mxu1 %v1504_v0  ;;  %v607_v62 = vmul.f32 %v1338_v61, %v1330_v45 }
 0x3a6   : > { %1225 = vmatmul.mubr.msk.f32.vlgmr.msra.gmra.mxu1 %vm357_vm2, %v607_v62 }
 0x3a7   : > { %1233 = vmatpush3.msra.mxu1 %v774_v63  ;;  %1234 = vmatprep.mubr.msk.f32.mxu1 %vm1505_vm0, %v1504_v0 }
 0x3a8   : > { %1242 = vmatprep.subr.mxu1 %v1504_v0 }
 0x3c6   : > { %v770_v1 = vpop.xlane.xlu0 %769 }
 0x3c7   : > { %1339 = vrcp.f32 %v770_v1 }
 0x3c8   : > { %1341 = vrcp.f32 %v935_v59 }
 0x3ca   : > { %v939_v5 = vpop.permute.xlu0 %938 }
 0x3d4   : > { %v1340_v2 = vpop.eup %1339 }
 0x3d5   : > { %v772_v3 = vmul.f32 %v1340_v2, %v1334_v52  ;;  %v1342_v4 = vpop.eup %1341 }
 0x3d6   : > { %v937_v6 = vmul.f32 %v1342_v4, %v1332_v47 }
 0x3d7   : > { %1235 = vmatmul.mubr.msk.f32.vlgmr.msra.gmra.mxu1 %vm357_vm2, %v772_v3 }
 0x3d8   : > { %1243 = vmatpush3.msra.mxu1 %v939_v5  ;;  %1244 = vmatprep.mubr.msk.f32.mxu1 %vm1505_vm0, %v1504_v0 }
 0x3db   : > { %1245 = vmatmul.mubr.msk.f32.vlgmr.msra.gmra.mxu1 %vm357_vm2, %v937_v6 }
 0x462   : > { %v515_v7 = vpop.f32.mrf.mxu1 }
 0x464   : > { %v1216_v8 = vpop.f32.mrf.mxu1 }
 0x466   : > { %v680_v9 = vpop.f32.mrf.mxu1 }
 0x467   : > { %1015 = vrot.lane.b32.xlu1 %v680_v9, %s1517_s28 }
 0x468   : > { %v1226_v10 = vpop.f32.mrf.mxu1 }
 0x497   : > { %v845_v11 = vpop.f32.mrf.mxu1 }
 0x498   : > { %1019 = vrot.lane.b32.xlu0 %v845_v11, %s1518_s12 }
 0x499   : > { %v1236_v12 = vpop.f32.mrf.mxu1 }
 0x49b   : > { %v1010_v13 = vpop.f32.mrf.mxu1 }
 0x49c   : > { %1023 = vrot.lane.b32.xlu1 %v1010_v13, %s1519_s21 }
 0x49d   : > { %v1246_v0 = vpop.f32.mrf.mxu1 }
 0x4d9   : > { %v1016_v14 = vpop.permute.xlu1 %1015 }
 0x4da   : > { %v1026_v16 = vsel %vm357_vm2, %v515_v7, %v1016_v14 }
 0x50a   : > { %v1020_v15 = vpop.permute.xlu0 %1019 }
 0x50b   : > { %v1028_v17 = vsel %vm1027_vm3, %v1026_v16, %v1020_v15 }
 0x50e   : > { %v1024_v18 = vpop.permute.xlu1 %1023 }
 0x50f   : > { %v1030_v19 = vsel %vm1029_vm4, %v1028_v17, %v1024_v18 }
 0x510   : > { %1031 = vst.msk [vmem:[%s260_s20] sm:$0xff] %vm274_vm1, %v1030_v19 }
 0x511   : > { %1438 = shalt.err (!%p1435_p9)
}
 0x512   : > { %s1439_s24 = scalar_lea.hbm %s1788_s11, 128  ;;  %s1443_s23 = scalar_lea.hbm %s1830_s4, 256 }
 0x513   : > { %p1440_p1 = scmp.ne.s32.totalorder %s1788_s11, %s1439_s24  ;;  %p1444_p7 = scmp.lt.s32.totalorder %s1788_s11, %s1830_s4 }
 0x514   : > { %p1445_p11 = scmp.lt.s32.totalorder %s1443_s23, %s1439_s24 }
 0x515   : > { %p1441_p4 = pnand %p1440_p1, %p1846_p10 }
 0x516   : > { %p1446_p8 = por %p1445_p11, %p1444_p7 }
 0x517   : > { %p1442_p6 = pneg %p1441_p4 }
 0x519   : > { %p1447_p3 = pnand %p1446_p8, %p1442_p6 }
 0x51b   : > { %1450 = shalt.err (!%p1447_p3)
}
 0x51c   : > { %1255 = dma.vmem_to_hbm [thread:$0]  (%p1846_p10), %s1047_s30, 128, %s1788_s11, %s1033_s29  }
 0x51d PF: > { %s1058_s21 = sand.u32 1, %s1485_s15   ;;  %p1847_p2 = scmp.ne.s32.totalorder %s1836_s22, 0 }
 0x51e   : > { %p1848_p12 = scmp.ge.s32.totalorder %s1497_s18, 2  ;;  %s1059_s14 = scalar_lea.sflag [#allocation4], %s1058_s21 }
 0x520   : > { %p1269_p13 = pnand %p1848_p12, %p1847_p2 }
 0x522   : > { %p1270_p0 = pneg %p1269_p13 }
 0x524   : > { %1480 = dma.done.wait (%p1270_p0), %s1059_s14, 128  }
 0x525   : > { %1482 = vsyncadd (%p1270_p0), %s1059_s14, 4294967168  ;;  %p20_p5 = scmp.ge.s32.totalorder %s1600_s27, 4   ;;  %s1849_s15 = smov %s1489_s16 }
 0x526   : > { %s1850_s16 = smov %s1493_s17  ;;  %s1851_s17 = smov %s1617_s9 }
 0x527   : > { %s1852_s18 = smov %s1600_s27  ;;  %22 = sbr.rel (!%p20_p5) target bundleno = 7 (0x7), region = 98 }
 0x52c   :  { %1064 = vsyncpa [#allocation3], 1 }
 0x52d   :  { %1066 = vsyncpa [#allocation3 + $0x1], 1 }
 0x52e   :  { %1067 = vsyncpa [#allocation6], 1 }
 0x52f   :  { %1069 = vsyncpa [#allocation6 + $0x1], 1 }
 0x530   :  { %1070 = vsyncpa [#allocation4], 1 }
 0x531   :  { %1072 = vsyncpa [#allocation4 + $0x1], 1 }

</bundles_post_ra>
